<compile_context>
chip_gen: v5e
topology: v5e:2x2
jax: 0.10.0
libtpu: 0.0.40
codegen_flags: <defaults>
</compile_context>

<pallas_src>
import math

import jax
import jax.numpy as jnp
from jax.experimental import pallas as pl
from jax.experimental.pallas import tpu as pltpu


# ----------------------------- kernels --------------------------------------


def _nw_linear_bias_kernel(x_ref, w_ref, b_ref, o_ref):
    # x_ref: (nb, tb, Fin), w_ref: (nb, Fin, Fout), b_ref: (nb, 1, Fout)
    acc = jnp.einsum(
        "nbf,nfo->nbo", x_ref[...], w_ref[...],
        preferred_element_type=jnp.float32)           # (nb, tb, Fout), f32 acc
    acc = acc + b_ref[...].astype(jnp.float32)         # broadcast over batch
    o_ref[...] = acc.astype(o_ref.dtype)


def _nw_linear_nobias_kernel(x_ref, w_ref, o_ref):
    acc = jnp.einsum(
        "nbf,nfo->nbo", x_ref[...], w_ref[...],
        preferred_element_type=jnp.float32)
    o_ref[...] = acc.astype(o_ref.dtype)


# --------------------------- block sizing -----------------------------------

_MAX_BLOCK_NEURONS = 256                 # bounds Mosaic unroll of batched matmul
_VMEM_BLOCK_BUDGET = 16 * 1024 * 1024    # bytes for double-buffered blocks
_VMEM_LIMIT_BYTES = 32 * 1024 * 1024     # >= v5e/v6e defaults, fits v7x 64 MiB


def _round_up(v, m):
    return ((v + m - 1) // m) * m


def _padded_tile_bytes(sub, lane, itemsize):
    """VMEM footprint of one (sub, lane) tile, padded to (8,128) 32-bit tiling."""
    sub_mult = 8 * max(1, 4 // max(1, itemsize))  # sub-32-bit packs along sublanes
    return _round_up(sub, sub_mult) * _round_up(lane, 128) * itemsize


def _pick_blocks(N, B, Fin, Fout, x_dtype, w_dtype, out_dtype, bias_dtype):
    """Choose (block_neurons, block_batch) under the VMEM budget."""
    x_it = jnp.dtype(x_dtype).itemsize
    w_it = jnp.dtype(w_dtype).itemsize
    o_it = jnp.dtype(out_dtype).itemsize
    b_bytes = (_padded_tile_bytes(1, Fout, jnp.dtype(bias_dtype).itemsize)
               if bias_dtype is not None else 0)

    def per_neuron(tb):
        return (_padded_tile_bytes(tb, Fin, x_it)
                + _padded_tile_bytes(Fin, Fout, w_it)
                + _padded_tile_bytes(tb, Fout, o_it)
                + b_bytes)

    # Batch tile: full batch when it fits with >=1 neuron per block; otherwise
    # the largest multiple-of-8 divisor of B that fits ((8,128) rule on the
    # second-to-last block dim).
    tb = B
    if 2 * per_neuron(B) > _VMEM_BLOCK_BUDGET:
        cands = [d for d in range(8, B, 8) if B % d == 0]
        fitting = [d for d in cands if 2 * per_neuron(d) <= _VMEM_BLOCK_BUDGET]
        if fitting:
            tb = fitting[-1]
        elif cands:
            tb = cands[0]
        # else: batch not tileable under the (8,128) rule; keep tb = B.
        # TODO(synk): add Fin (reduction) / Fout grid tiling with an f32 VMEM
        # accumulator for per-neuron weights too large for a single VMEM block.

    cap = max(1, _VMEM_BLOCK_BUDGET // (2 * per_neuron(tb)))  # 2x: double buffer
    cap = min(cap, _MAX_BLOCK_NEURONS, N)

    batch_steps = B // tb
    best = None        # largest divisor of N <= cap
    best_even = None   # largest such divisor giving an even total grid (v7x 2 TCs)
    for d in range(cap, 0, -1):
        if N % d == 0:
            if best is None:
                best = d
            if best_even is None and ((N // d) * batch_steps) % 2 == 0:
                best_even = d
            if best is not None and best_even is not None:
                break
    nb = best_even if (best_even is not None and best_even * 2 >= best) else best
    return nb, tb


# ----------------------------- wrapper --------------------------------------


def neuronwise_linear(x, weight, bias=None, *, batch_first=False,
                      block_neurons=None, block_batch=None,
                      use_bf16=False, interpret=False):
    """Pallas TPU forward of NeuronwiseLinear.

    x: (N, B, Fin) (or (B, N, Fin) if batch_first), weight: (N, Fin, Fout),
    bias: (N, 1, Fout) or None.  Returns (N, B, Fout) (or (B, N, Fout)).
    """
    if batch_first:
        x = jnp.transpose(x, (1, 0, 2))

    N, B, Fin = x.shape
    Nw, Fin_w, Fout = weight.shape
    assert Nw == N and Fin_w == Fin, "weight shape must be (N, Fin, Fout)"
    out_dtype = x.dtype

    x_in, w_in = x, weight
    if use_bf16:
        # Halve HBM bytes on the (dominant) weight stream; accumulate in f32.
        x_in = x_in.astype(jnp.bfloat16)
        w_in = w_in.astype(jnp.bfloat16)

    has_bias = bias is not None
    nb_auto, tb_auto = _pick_blocks(
        N, B, Fin, Fout, x_in.dtype, w_in.dtype, out_dtype,
        bias.dtype if has_bias else None)
    nb = nb_auto if block_neurons is None else int(block_neurons)
    tb = tb_auto if block_batch is None else int(block_batch)
    assert N % nb == 0, "block_neurons must divide num_neurons"
    assert B % tb == 0 and (tb == B or tb % 8 == 0), \
        "block_batch must divide batch and be a multiple of 8 (or equal batch)"

    # Batch axis innermost: the weight block index is constant across
    # consecutive steps, so it is not re-fetched per batch tile.
    grid = (N // nb, B // tb)

    in_specs = [
        pl.BlockSpec((nb, tb, Fin), lambda g, b: (g, b, 0)),
        pl.BlockSpec((nb, Fin, Fout), lambda g, b: (g, 0, 0)),
    ]
    args = [x_in, w_in]
    if has_bias:
        in_specs.append(pl.BlockSpec((nb, 1, Fout), lambda g, b: (g, 0, 0)))
        args.append(bias)
        kernel = _nw_linear_bias_kernel
    else:
        kernel = _nw_linear_nobias_kernel

    bytes_accessed = (x_in.size * x_in.dtype.itemsize
                      + w_in.size * w_in.dtype.itemsize
                      + N * B * Fout * jnp.dtype(out_dtype).itemsize
                      + (bias.size * bias.dtype.itemsize if has_bias else 0))
    cost = pl.CostEstimate(flops=2 * N * B * Fin * Fout,
                           transcendentals=0,
                           bytes_accessed=bytes_accessed)

    out = pl.pallas_call(
        kernel,
        out_shape=jax.ShapeDtypeStruct((N, B, Fout), out_dtype),
        grid_spec=pltpu.PrefetchScalarGridSpec(
            num_scalar_prefetch=0,
            grid=grid,
            in_specs=in_specs,
            out_specs=pl.BlockSpec((nb, tb, Fout), lambda g, b: (g, b, 0)),
        ),
        compiler_params=pltpu.CompilerParams(
            dimension_semantics=("parallel", "parallel"),
            vmem_limit_bytes=_VMEM_LIMIT_BYTES,
        ),
        cost_estimate=cost,
        interpret=interpret,
    )(*args)

    if batch_first:
        out = jnp.transpose(out, (1, 0, 2))
    return out


# ----------------------------- init / demo ----------------------------------


def init_params(key, num_neurons, in_features, out_features):
    """Matches neuronwise_kaiming_uniform(fan=out_features, a=sqrt(5)) + bias init."""
    kw, kb = jax.random.split(key)
    a = math.sqrt(5.0)
    gain = math.sqrt(2.0 / (1.0 + a * a))          # leaky_relu gain
    std = gain / math.sqrt(out_features)           # fan = out_features (as in module)
    w_bound = math.sqrt(3.0) * std
    weight = jax.random.uniform(
        kw, (num_neurons, in_features, out_features),
        minval=-w_bound, maxval=w_bound, dtype=jnp.float32)
    b_bound = 1.0 / math.sqrt(out_features)
    bias = jax.random.uniform(
        kb, (num_neurons, 1, out_features),
        minval=-b_bound, maxval=b_bound, dtype=jnp.float32)
    return weight, bias


if __name__ == "__main__":
    # Small shapes consistent with the module's forward (batch_first=False).
    num_neurons, batch, in_features, out_features = 16, 8, 32, 32

    key = jax.random.PRNGKey(0)
    k_x, k_p, k_x2 = jax.random.split(key, 3)

    x = jax.random.normal(
        k_x, (num_neurons, batch, in_features), dtype=jnp.float32)
    weight, bias = init_params(k_p, num_neurons, in_features, out_features)

    ref = jnp.matmul(x, weight) + bias

    # f32 path (default, auto block sizing).
    out = jax.block_until_ready(neuronwise_linear(x, weight, bias))
    assert out.shape == (num_neurons, batch, out_features)
    assert jnp.allclose(out, ref, atol=1e-4, rtol=1e-4)

    # no-bias path (module supports bias=False).
    out_nb = jax.block_until_ready(neuronwise_linear(x, weight, None))
    assert jnp.allclose(out_nb, jnp.matmul(x, weight), atol=1e-4, rtol=1e-4)

    # bf16 weight/activation streaming path (looser tolerance vs f32 reference).
    out_bf16 = jax.block_until_ready(
        neuronwise_linear(x, weight, bias, use_bf16=True))
    assert jnp.allclose(out_bf16, ref, atol=5e-2, rtol=5e-2)

    # batch_first path.
    x_bf = jnp.transpose(x, (1, 0, 2))
    out_bfirst = jax.block_until_ready(
        neuronwise_linear(x_bf, weight, bias, batch_first=True))
    assert jnp.allclose(out_bfirst, jnp.transpose(ref, (1, 0, 2)),
                        atol=1e-4, rtol=1e-4)

    # batch-tiled 2D-grid path (forced small neuron/batch tiles).
    x2 = jax.random.normal(
        k_x2, (num_neurons, 16, in_features), dtype=jnp.float32)
    ref2 = jnp.matmul(x2, weight) + bias
    out2 = jax.block_until_ready(
        neuronwise_linear(x2, weight, bias, block_neurons=8, block_batch=8))
    assert jnp.allclose(out2, ref2, atol=1e-4, rtol=1e-4)

    print("KERNEL_OK")
</pallas_src>

<mosaic_0001>
module attributes {stable_mosaic.version = 11 : i64} {
  func.func @_nw_linear_bias_kernel(%arg0: i32, %arg1: i32, %arg2: memref<8x8x32xf32, #tpu.memory_space<vmem>>, %arg3: memref<8x32x32xf32, #tpu.memory_space<vmem>>, %arg4: memref<8x1x32xf32, #tpu.memory_space<vmem>>, %arg5: memref<8x8x32xf32, #tpu.memory_space<vmem>>) attributes {dimension_semantics = [#tpu.dimension_semantics<parallel>, #tpu.dimension_semantics<parallel>], iteration_bounds = array<i64: 2, 1>, scalar_prefetch = 0 : i64, scratch_operands = 0 : i64, tpu.core_type = #tpu.core_type<tc>, window_params = [{transform_indices = @transform_0, window_bounds = array<i64: 8, 8, 32>}, {transform_indices = @transform_1, window_bounds = array<i64: 8, 32, 32>}, {transform_indices = @transform_2, window_bounds = array<i64: 8, 1, 32>}, {transform_indices = @transform_3, window_bounds = array<i64: 8, 8, 32>}]} {
    %c0 = arith.constant 0 : index
    %c0_0 = arith.constant 0 : index
    %c0_1 = arith.constant 0 : index
    %0 = vector.load %arg2[%c0, %c0_0, %c0_1] : memref<8x8x32xf32, #tpu.memory_space<vmem>>, vector<8x8x32xf32>
    %c0_2 = arith.constant 0 : index
    %c0_3 = arith.constant 0 : index
    %c0_4 = arith.constant 0 : index
    %1 = vector.load %arg3[%c0_2, %c0_3, %c0_4] : memref<8x32x32xf32, #tpu.memory_space<vmem>>, vector<8x32x32xf32>
    "tpu.trace_start"() <{level = 10 : i32, message = "nbf,nfo->nbo"}> : () -> ()
    %cst = arith.constant dense<0.000000e+00> : vector<8x8x32xf32>
    %2 = tpu.matmul %0, %1, %cst {dimension_numbers = #tpu.dot_dimension_numbers<[2], [1], [1], [2], [0, 0, 0, 1, 1, 2], [0], [0]>} : vector<8x8x32xf32>, vector<8x32x32xf32>, vector<8x8x32xf32> -> vector<8x8x32xf32>
    "tpu.trace_stop"() : () -> ()
    %c0_5 = arith.constant 0 : index
    %c0_6 = arith.constant 0 : index
    %c0_7 = arith.constant 0 : index
    %3 = vector.load %arg4[%c0_5, %c0_6, %c0_7] : memref<8x1x32xf32, #tpu.memory_space<vmem>>, vector<8x1x32xf32>
    %4 = vector.broadcast %3 : vector<8x1x32xf32> to vector<8x8x32xf32>
    %5 = arith.addf %2, %4 : vector<8x8x32xf32>
    %c0_8 = arith.constant 0 : index
    %c0_9 = arith.constant 0 : index
    %c0_10 = arith.constant 0 : index
    %6 = vector.load %arg5[%c0_8, %c0_9, %c0_10] : memref<8x8x32xf32, #tpu.memory_space<vmem>>, vector<8x8x32xf32>
    tpu.vector_store %arg5[%c0_8, %c0_9, %c0_10], %5 {strides = array<i32>} : memref<8x8x32xf32, #tpu.memory_space<vmem>>, vector<8x8x32xf32>,
    return
  }
  func.func @transform_0(%arg0: i32, %arg1: i32) -> (i32, i32, i32) {
    %c0_i32 = arith.constant 0 : i32
    %c0_i32_0 = arith.constant 0 : i32
    return %arg0, %arg1, %c0_i32 : i32, i32, i32
  }
  func.func @transform_1(%arg0: i32, %arg1: i32) -> (i32, i32, i32) {
    %c0_i32 = arith.constant 0 : i32
    %c0_i32_0 = arith.constant 0 : i32
    %c0_i32_1 = arith.constant 0 : i32
    return %arg0, %c0_i32, %c0_i32_0 : i32, i32, i32
  }
  func.func @transform_2(%arg0: i32, %arg1: i32) -> (i32, i32, i32) {
    %c0_i32 = arith.constant 0 : i32
    %c0_i32_0 = arith.constant 0 : i32
    %c0_i32_1 = arith.constant 0 : i32
    return %arg0, %c0_i32, %c0_i32_0 : i32, i32, i32
  }
  func.func @transform_3(%arg0: i32, %arg1: i32) -> (i32, i32, i32) {
    %c0_i32 = arith.constant 0 : i32
    %c0_i32_0 = arith.constant 0 : i32
    return %arg0, %arg1, %c0_i32 : i32, i32, i32
  }
}

</mosaic_0001>

<bundles_post_ra>
// kernel: tpu_custom_call.1
= control target key start
LH: loop header
LB: loop body
LE: loop exit
PB: predicated region body
PF: predicated region fallthrough
CT: control target
= control target key end

     0   :  { %s1268_s0 = inlined_call_operand.hbm [shape: f32[16,8,32], index: 0, kind: input, shape index: {}]   ;;  %s1269_s1 = inlined_call_operand.hbm [shape: f32[16,32,32], index: 1, kind: input, shape index: {}]   ;;  %s1270_s2 = inlined_call_operand.hbm [shape: f32[16,1,32], index: 2, kind: input, shape index: {}]   ;;  %s1271_s3 = inlined_call_operand.hbm [shape: f32[16,8,32], index: 3, kind: output, shape index: {}]  }
   0x1   :  { %1278 = sst [smem:[#allocation18_spill]] %s1269_s1 }
   0x2   :  { %8 = vsyncpa [#allocation3], 0 }
   0x3   :  { %10 = vsyncpa [#allocation3 + $0x1], 0 }
   0x4   :  { %11 = vsyncpa [#allocation6], 0 }
   0x5   :  { %13 = vsyncpa [#allocation6 + $0x1], 0 }
   0x6   :  { %14 = vsyncpa [#allocation4], 0 }
   0x7   :  { %16 = vsyncpa [#allocation4 + $0x1], 0  ;;  %s1028_s12 = smov 0   ;;  %s1030_s13 = smov 0  }
   0x8   :  { %s1032_s14 = smov 0   ;;  %s1034_s15 = smov 0  }
   0x9   :  { %s1036_s16 = smov 0   ;;  %s1038_s17 = smov 0  }
   0xa LB: > { %1279 = sst [smem:[#allocation12_spill]] %s980_s12  ;;  %s1059_s18 = sadd.s32 4294967295, %s1000_s17   ;;  %s1000_s17 = sphi %s1038_s17, %s22_s17   ;;  %s996_s16 = sphi %s1036_s16, %s1301_s16   ;;  %s992_s15 = sphi %s1034_s15, %s1300_s15   ;;  %s988_s14 = sphi %s1032_s14, %s1296_s14   ;;  %s984_s13 = sphi %s1030_s13, %s1299_s13   ;;  %s980_s12 = sphi %s1028_s12, %s1298_s12  }
   0xb   : > { %1280 = sst [smem:[#allocation13_spill]] %s988_s14  ;;  %s704_s19 = sadd.s32 4294967294, %s1000_s17  }
   0xc   : > { %1281 = sst [smem:[#allocation14_spill]] %s1000_s17  ;;  %s34_s20 = sadd.s32 1, %s996_s16 }
   0xd   : > { %s43_s21 = sadd.s32 1, %s988_s14  ;;  %p36_p0 = scmp.ge.s32.totalorder %s34_s20, 2 }
   0xe   : > { %p50_p1 = scmp.ne.s32.totalorder %s988_s14, %s984_s13  ;;  %p51_p2 = scmp.eq.s32.totalorder %s1000_s17, 0 }
   0xf   : > { %p56_p3 = scmp.ne.s32.totalorder %s984_s13, %s980_s12  ;;  %s1303_s20 = smov (%p36_p0, %s34_s20), 0 }
  0x10   : > { %1282 = sst [smem:[#allocation15_spill]] %s1303_s20  ;;  %p1071_p4 = por %p51_p2, %p50_p1 }
  0x11   : > { %p57_p5 = scmp.eq.s32.totalorder %s1059_s18, 0  ;;  %s38_s23 = ssub.s32 %s996_s16, %s1303_s20 }
  0x12   : > { %p134_p6 = scmp.eq.s32.totalorder %s1059_s18, 1  ;;  %p41_p7 = scmp.eq.s32.totalorder %s38_s23, 0 }
  0x13   : > { %p1079_p8 = por %p57_p5, %p56_p3  ;;  %p140_p10 = scmp.eq.s32.totalorder %s704_s19, 1 }
  0x14   : > { %p1083_p9 = por %p134_p6, %p50_p1  ;;  %p706_p12 = scmp.ge.s32.totalorder %s1000_s17, 2 }
  0x15   : > { %s1088_s26 = scalar_select %p41_p7, %s988_s14, %s43_s21  }
  0x16   : > { %p1090_p11 = por %p140_p10, %p56_p3  ;;  %p760_p13 = scmp.lt.s32.totalorder %s1000_s17, 2 }
  0x17   : > { %1286 = sst [smem:[#allocation16_spill]] %s1088_s26  ;;  %s1097_s28 = sand.u32 1, %s988_s14  }
  0x18   : > { %s1287_s27 = scalar_select %p1090_p11, 1, 0 }
  0x19   : > { %p1101_p0 = pnand %p760_p13, %p1071_p4  ;;  %s183_s30 = sand.u32 1, %s1000_s17  }
  0x1a   : > { %1288 = sst [smem:[#allocation17_spill]] %s1287_s27  ;;  %s710_s4 = sshll.u32 %s1097_s28, 8 }
  0x1b   : > { %s736_s5 = sshll.u32 %s996_s16, 8  ;;  %s187_s6 = scalar_lea.vmem [#allocation5], %s710_s4 }
  0x1c   : > { %s196_s7 = sshll.u32 %s187_s6, 4  ;;  %s1290_s1 = sld [smem:[#allocation18_spill]]  ;;  %s197_s7 = int_to_ptr.vmem [resolvable:$true] %s196_s7 }
  0x1d   : > { %p716_p1 = scmp.ge.s32.totalorder %s1000_s17, 1  ;;  %p225_p2 = scmp.lt.s32.totalorder %s1000_s17, 3 }
  0x1e   : > { %s1113_s19 = scalar_lea.sflag [#allocation6], %s183_s30  ;;  %s1002_s21 = smov 128  }
  0x1f   : > { %s1003_s22 = smov 8   ;;  %p1118_p3 = pnand %p716_p1, %p225_p2 }
  0x20   : > { %s707_s4 = sshll.u32 %s1097_s28, 6  ;;  %s161_s20 = scalar_lea.sflag [#allocation3], %s1097_s28 }
  0x22   : > { %s193_s10 = scalar_lea.hbm %s1290_s1, %s736_s5  ;;  %s734_s5 = sshll.u32 %s996_s16, 6 }
  0x23   : > { %s194_s11 = sshll.u32 %s193_s10, 4  ;;  %s170_s9 = scalar_lea.hbm %s1268_s0, %s734_s5  ;;  %s195_s11 = int_to_ptr.hbm [resolvable:$true] %s194_s11 }
  0x24   : > { %752 = dma.hbm_to_vmem [thread:$0]  (!%p1101_p0), %s195_s11, 4096, %s197_s7, %s1113_s19, %s1002_s21, %s1002_s21, %s1003_s22  }
  0x25   : > { %s171_s10 = sshll.u32 %s170_s9, 4  ;;  %s164_s1 = scalar_lea.vmem [#allocation2], %s707_s4  ;;  %s172_s10 = int_to_ptr.hbm [resolvable:$true] %s171_s10 }
  0x26   : > { %s173_s30 = sshll.u32 %s164_s1, 4  ;;  %s714_s7 = sshll.u32 %s1097_s28, 3  ;;  %s174_s30 = int_to_ptr.vmem [resolvable:$true] %s173_s30 }
  0x27   : > { %749 = dma.hbm_to_vmem [thread:$0]  (!%p1101_p0), %s172_s10, 1024, %s174_s30, %s161_s20, %s1002_s21, %s1002_s21, %s1003_s22  }
  0x28   : > { %s715_s11 = sshll.u32 %s996_s16, 3  ;;  %s210_s12 = scalar_lea.vmem [#allocation7], %s714_s7 }
  0x29   : > { %s214_s17 = scalar_lea.hbm %s1270_s2, %s715_s11  ;;  %s217_s6 = sshll.u32 %s210_s12, 4  ;;  %s218_s6 = int_to_ptr.vmem [resolvable:$true] %s217_s6 }
  0x2a   : > { %s215_s27 = sshll.u32 %s214_s17, 4  ;;  %s1004_s4 = smov 16   ;;  %s216_s27 = int_to_ptr.hbm [resolvable:$true] %s215_s27 }
  0x2b   : > { %s1005_s5 = smov 1   ;;  %229 = sbr.rel (%p1118_p3) target bundleno = 209 (0xd1), region = 32 }
  0x2c   : > { %755 = dma.hbm_to_vmem [thread:$0]  (!%p1101_p0), %s216_s27, 128, %s218_s6, %s1113_s19, %s1004_s4, %s1004_s4, %s1005_s5  }
  0x2d   : > { %s1141_s1 = sand.u32 (!%p1118_p3), 1, %s984_s13  }
  0x2e   : > { %s717_s14 = sshll.u32 (!%p1118_p3), %s1141_s1, 6  ;;  %s232_s17 = scalar_lea.sflag (!%p1118_p3), [#allocation3], %s1141_s1 }
  0x2f   : > { %s1147_s12 = scalar_lea.vmem (!%p1118_p3), [#allocation2], %s717_s14 }
  0x30   : > { %967 = dma.done.wait (%p1079_p8), %s232_s17, 1024  }
  0x31   : > { %969 = vsyncadd (%p1079_p8), %s232_s17, 4294966272  ;;  %s241_s20 = sand.u32 1, %s1059_s18   ;;  %s718_s26 = sshll.u32 %s1141_s1, 8 }
  0x32   : > { %s242_s27 = scalar_lea.sflag [#allocation6], %s241_s20  ;;  %s1155_s28 = scalar_lea.vmem [#allocation5], %s718_s26 }
  0x33   : > { %971 = dma.done.wait (%p1079_p8), %s242_s27, 4224  }
  0x34   : > { %973 = vsyncadd (%p1079_p8), %s242_s27, 4294963072  ;;  %v312_v0 = vld [vmem:[%s1155_s28 + $0x58] sm:$0xff]  ;;  %v311_v2 = vld [vmem:[%s1155_s28 + $0x50] sm:$0xff]  ;;  %vm365_vm0 = vcmask 261120   ;;  %s719_s18 = sshll.u32 %s1141_s1, 3  ;;  %s737_s29 = sshll.u32 %s992_s15, 6 }
  0x35   : > { %v316_v1 = vld [vmem:[%s1155_s28 + $0x78] sm:$0xff]  ;;  %427 = vmatpush.msra.mxu2 %v312_v0  ;;  %v315_v3 = vld [vmem:[%s1155_s28 + $0x70] sm:$0xff]  ;;  %v310_v4 = vld [vmem:[%s1155_s28 + $0x48] sm:$0xff]  ;;  %s1198_s24 = scalar_lea.vmem [#allocation7], %s719_s18  ;;  %s288_s19 = scalar_lea.vmem [#allocation8], %s717_s14 }
  0x36   : > { %450 = vmatpush.msra.mxu3 %v316_v1  ;;  %v314_v5 = vld [vmem:[%s1155_s28 + $0x68] sm:$0xff]  ;;  %v304_v6 = vld [vmem:[%s1155_s28 + $0x18] sm:$0xff]  ;;  %v309_v8 = vld [vmem:[%s1155_s28 + $0x40] sm:$0xff]  ;;  %s571_s23 = scalar_lea.hbm %s1271_s3, %s737_s29  ;;  %s572_s15 = sshll.u32 %s288_s19, 4  ;;  %s573_s15 = int_to_ptr.vmem [resolvable:$true] %s572_s15 }
  0x37   : > { %v308_v7 = vld [vmem:[%s1155_s28 + $0x38] sm:$0xff]  ;;  %428 = vmatpush.msra.mxu2 %v311_v2  ;;  %381 = vmatpush.msra.mxu0 %v304_v6  ;;  %v313_v9 = vld [vmem:[%s1155_s28 + $0x60] sm:$0xff]  ;;  %v303_v10 = vld [vmem:[%s1155_s28 + $0x10] sm:$0xff]  ;;  %s574_s8 = sshll.u32 %s571_s23, 4  ;;  %s559_s9 = scalar_lea.sflag [#allocation4], %s1141_s1  ;;  %s575_s8 = int_to_ptr.hbm [resolvable:$true] %s574_s8 }
  0x38   : > { %451 = vmatpush.msra.mxu3 %v315_v3  ;;  %404 = vmatpush.msra.mxu1 %v308_v7  ;;  %v295_v11 = vld [vmem:[%s1147_s12 + $0x10] sm:$0xff]  ;;  %v296_v12 = vld [vmem:[%s1147_s12 + $0x18] sm:$0xff]  ;;  %v302_v16 = vld [vmem:[%s1155_s28 + $0x8] sm:$0xff]  ;;  %s928_s10 = sshra.s32 %s575_s8, 4  ;;  %s934_s6 = scalar_lea.hbm %s1271_s3, 128  ;;  %s929_s10 = int_to_ptr.hbm [resolvable:$true] %s928_s10 }
  0x39   : > { %429 = vmatpush.msra.mxu2 %v310_v4  ;;  %v307_v13 = vld [vmem:[%s1155_s28 + $0x30] sm:$0xff]  ;;  %v328_v14 = vld [vmem:[%s1155_s28 + $0xd8] sm:$0xff]  ;;  %382 = vmatpush.msra.mxu0 %v303_v10  ;;  %v306_v17 = vld [vmem:[%s1155_s28 + $0x28] sm:$0xff]  ;;  %s930_s30 = scalar_lea.hbm %s929_s10, 64  ;;  %p935_p7 = scmp.lt.s32.totalorder %s929_s10, %s1271_s3 }
  0x3a   : > { %452 = vmatpush.msra.mxu3 %v314_v5  ;;  %v332_v15 = vld [vmem:[%s1155_s28 + $0xf8] sm:$0xff]  ;;  %405 = vmatpush.msra.mxu1 %v307_v13  ;;  %v327_v18 = vld [vmem:[%s1155_s28 + $0xd0] sm:$0xff]  ;;  %v326_v20 = vld [vmem:[%s1155_s28 + $0xc8] sm:$0xff]  ;;  %p931_p4 = scmp.ne.s32.totalorder %s929_s10, %s930_s30  ;;  %p936_p8 = scmp.lt.s32.totalorder %s934_s6, %s930_s30 }
  0x3b   : > { %430 = vmatpush.msra.mxu2 %v309_v8  ;;  %v331_v19 = vld [vmem:[%s1155_s28 + $0xf0] sm:$0xff]  ;;  %v301_v21 = vld [vmem:[%s1155_s28] sm:$0xff]  ;;  %383 = vmatpush.msra.mxu0 %v302_v16  ;;  %v330_v23 = vld [vmem:[%s1155_s28 + $0xe8] sm:$0xff] }
  0x3c   : > { %453 = vmatpush.msra.mxu3 %v313_v9  ;;  %723 = vmatmul.msk.f32.vlgmr.msra.gmra.mxu2 %vm365_vm0, %v295_v11  ;;  %v305_v22 = vld [vmem:[%s1155_s28 + $0x20] sm:$0xff]  ;;  %v294_v25 = vld [vmem:[%s1147_s12 + $0x8] sm:$0xff]  ;;  %v320_v26 = vld [vmem:[%s1155_s28 + $0x98] sm:$0xff]  ;;  %p932_p5 = pnand %p931_p4, %p1083_p9  ;;  %p937_p10 = por %p936_p8, %p935_p7 }
  0x3d   : > { %724 = vmatmul.msk.f32.vlgmr.msra.gmra.mxu3 %vm365_vm0, %v296_v12  ;;  %519 = vmatpush.msrb.mxu2 %v328_v14  ;;  %v293_v24 = vld [vmem:[%s1147_s12] sm:$0xff]  ;;  %v324_v27 = vld [vmem:[%s1155_s28 + $0xb8] sm:$0xff]  ;;  %v319_v30 = vld [vmem:[%s1155_s28 + $0x90] sm:$0xff] }
  0x3e   : > { %542 = vmatpush.msrb.mxu3 %v332_v15  ;;  %406 = vmatpush.msra.mxu1 %v306_v17  ;;  %v325_v28 = vld [vmem:[%s1155_s28 + $0xc0] sm:$0xff]  ;;  %v323_v31 = vld [vmem:[%s1155_s28 + $0xb0] sm:$0xff]  ;;  %v300_v33 = vld [vmem:[%s1147_s12 + $0x38] sm:$0xff]  ;;  %p933_p6 = pneg %p932_p5 }
  0x3f   : > { %520 = vmatpush.msrb.mxu2 %v327_v18  ;;  %384 = vmatpush.msra.mxu0 %v301_v21  ;;  %v329_v29 = vld [vmem:[%s1155_s28 + $0xe0] sm:$0xff]  ;;  %v299_v32 = vld [vmem:[%s1147_s12 + $0x30] sm:$0xff]  ;;  %v318_v34 = vld [vmem:[%s1155_s28 + $0x88] sm:$0xff] }
  0x40   : > { %543 = vmatpush.msrb.mxu3 %v331_v19  ;;  %407 = vmatpush.msra.mxu1 %v305_v22  ;;  %v322_v35 = vld [vmem:[%s1155_s28 + $0xa8] sm:$0xff]  ;;  %v317_v36 = vld [vmem:[%s1155_s28 + $0x80] sm:$0xff]  ;;  %p938_p13 = pnand %p937_p10, %p933_p6 }
  0x41   : > { %521 = vmatpush.msrb.mxu2 %v326_v20  ;;  %721 = vmatmul.msk.f32.vlgmr.msra.gmra.mxu0 %vm365_vm0, %v293_v24  ;;  %v321_v37 = vld [vmem:[%s1155_s28 + $0xa0] sm:$0xff]  ;;  %v298_v39 = vld [vmem:[%s1147_s12 + $0x28] sm:$0xff] }
  0x42   : > { %544 = vmatpush.msrb.mxu3 %v330_v23  ;;  %722 = vmatmul.msk.f32.vlgmr.msra.gmra.mxu1 %vm365_vm0, %v294_v25  ;;  %v297_v38 = vld [vmem:[%s1147_s12 + $0x20] sm:$0xff] }
  0x43   : > { %473 = vmatpush.msrb.mxu0 %v320_v26  ;;  %496 = vmatpush.msrb.mxu1 %v324_v27  ;;  %v816_v40 = vld [vmem:[%s1198_s24] ss:$0 sm:$0xff]  ;;  %v817_v41 = vld [vmem:[%s1198_s24 + $0x1] ss:$0 sm:$0xff]  ;;  %v818_v42 = vld [vmem:[%s1198_s24 + $0x2] ss:$0 sm:$0xff] }
  0x44   : > { %522 = vmatpush.msrb.mxu2 %v325_v28  ;;  %545 = vmatpush.msrb.mxu3 %v329_v29  ;;  %v819_v43 = vld [vmem:[%s1198_s24 + $0x3] ss:$0 sm:$0xff]  ;;  %v820_v52 = vld [vmem:[%s1198_s24 + $0x4] ss:$0 sm:$0xff]  ;;  %v821_v53 = vld [vmem:[%s1198_s24 + $0x5] ss:$0 sm:$0xff] }
  0x45   : > { %474 = vmatpush.msrb.mxu0 %v319_v30  ;;  %497 = vmatpush.msrb.mxu1 %v323_v31  ;;  %v822_v54 = vld [vmem:[%s1198_s24 + $0x6] ss:$0 sm:$0xff]  ;;  %v823_v55 = vld [vmem:[%s1198_s24 + $0x7] ss:$0 sm:$0xff] }
  0x46   : > { %727 = vmatmul.msk.f32.vlgmr.msrb.gmra.mxu2 %vm365_vm0, %v299_v32  ;;  %728 = vmatmul.msk.f32.vlgmr.msrb.gmra.mxu3 %vm365_vm0, %v300_v33 }
  0x47   : > { %475 = vmatpush.msrb.mxu0 %v318_v34  ;;  %498 = vmatpush.msrb.mxu1 %v322_v35 }
  0x49   : > { %476 = vmatpush.msrb.mxu0 %v317_v36  ;;  %499 = vmatpush.msrb.mxu1 %v321_v37 }
  0x4a   : > { %725 = vmatmul.msk.f32.vlgmr.msrb.gmra.mxu0 %vm365_vm0, %v297_v38  ;;  %726 = vmatmul.msk.f32.vlgmr.msrb.gmra.mxu1 %vm365_vm0, %v298_v39 }
  0xbe   : > { %v386_v44 = vpop.f32.mrf.mxu0 }
  0xbf   : > { %v409_v45 = vpop.f32.mrf.mxu1  ;;  %v387_v46 = vadd.f32 %v816_v40, %v386_v44  ;;  %v432_v48 = vpop.f32.mrf.mxu2 }
  0xc0   : > { %v410_v47 = vadd.f32 %v817_v41, %v409_v45  ;;  %v455_v49 = vpop.f32.mrf.mxu3  ;;  %v433_v50 = vadd.f32 %v818_v42, %v432_v48 }
  0xc1   : > { %v456_v51 = vadd.f32 %v819_v43, %v455_v49  ;;  %550 = vst.msk [vmem:[%s288_s19] sm:$0xff] %vm365_vm0, %v387_v46 }
  0xc2   : > { %551 = vst.msk [vmem:[%s288_s19 + $0x8] sm:$0xff] %vm365_vm0, %v410_v47 }
  0xc3   : > { %552 = vst.msk [vmem:[%s288_s19 + $0x10] sm:$0xff] %vm365_vm0, %v433_v50 }
  0xc4   : > { %553 = vst.msk [vmem:[%s288_s19 + $0x18] sm:$0xff] %vm365_vm0, %v456_v51 }
  0xc7   : > { %v478_v56 = vpop.f32.mrf.mxu0  ;;  %v501_v57 = vpop.f32.mrf.mxu1 }
  0xc8   : > { %v479_v58 = vadd.f32 %v820_v52, %v478_v56  ;;  %v502_v59 = vadd.f32 %v821_v53, %v501_v57 }
  0xc9   : > { %v524_v60 = vpop.f32.mrf.mxu2  ;;  %v547_v61 = vpop.f32.mrf.mxu3 }
  0xca   : > { %554 = vst.msk [vmem:[%s288_s19 + $0x20] sm:$0xff] %vm365_vm0, %v479_v58  ;;  %v525_v62 = vadd.f32 %v822_v54, %v524_v60  ;;  %v548_v63 = vadd.f32 %v823_v55, %v547_v61 }
  0xcb   : > { %555 = vst.msk [vmem:[%s288_s19 + $0x28] sm:$0xff] %vm365_vm0, %v502_v59 }
  0xcc   : > { %556 = vst.msk [vmem:[%s288_s19 + $0x30] sm:$0xff] %vm365_vm0, %v525_v62 }
  0xcd   : > { %557 = vst.msk [vmem:[%s288_s19 + $0x38] sm:$0xff] %vm365_vm0, %v548_v63 }
  0xce   : > { %941 = shalt.err (!%p938_p13)
}
  0xcf   : > { %s1006_s1 = smov 128   ;;  %s1007_s14 = smov 8  }
  0xd0   : > { %744 = dma.vmem_to_hbm [thread:$0]  (%p1083_p9), %s573_s15, 1024, %s575_s8, %s559_s9, %s1006_s1, %s1006_s1, %s1007_s14  }
  0xd1 PF: > { %s1292_s17 = sld [smem:[#allocation12_spill]]  ;;  %p757_p0 = pnand %p706_p12, %p1090_p11 }
  0xd2   : > { %s1294_s20 = sld [smem:[#allocation14_spill]] }
  0xd3   : > { %p758_p1 = pneg %p757_p0 }
  0xd7   : > { %s589_s26 = sand.u32 1, %s1292_s17  }
  0xd8   : > { %s590_s27 = scalar_lea.sflag [#allocation4], %s589_s26 }
  0xd9   : > { %975 = dma.done.wait (%p758_p1), %s590_s27, 1024  }
  0xda   : > { %977 = vsyncadd (%p758_p1), %s590_s27, 4294966272  ;;  %s22_s17 = sadd.s32 1, %s1294_s20   ;;  %s1295_s28 = sld [smem:[#allocation13_spill]] }
  0xdb   : > { %p19_p2 = scmp.ge.s32.totalorder %s22_s17, 4   ;;  %s1296_s14 = sld [smem:[#allocation16_spill]] }
  0xdc   : > { %s1297_s25 = sld [smem:[#allocation15_spill]]  ;;  %s1298_s12 = smov %s984_s13 }
  0xdd   : > { %s1300_s15 = smov %s996_s16 }
  0xde   :  { %21 = sbr.rel (!%p19_p2) target bundleno = 10 (0xa), region = 101 }
  0xe0   : > { %s1299_s13 = smov %s1295_s28 }
  0xe2   : > { %s1301_s16 = smov %s1297_s25 }
  0xe3   :  { %596 = vsyncpa [#allocation3], 1 }
  0xe4   :  { %598 = vsyncpa [#allocation3 + $0x1], 1 }
  0xe5   :  { %599 = vsyncpa [#allocation6], 1 }
  0xe6   :  { %601 = vsyncpa [#allocation6 + $0x1], 1 }
  0xe7   :  { %602 = vsyncpa [#allocation4], 1 }
  0xe8   :  { %604 = vsyncpa [#allocation4 + $0x1], 1 }

</bundles_post_ra>
